<compile_context>
chip_gen: v5e
topology: v5e:2x2
jax: 0.10.0
libtpu: 0.0.40
codegen_flags: <defaults>
</compile_context>

<pallas_src>
import jax
import jax.numpy as jnp
from jax.experimental import pallas as pl
from jax.experimental.pallas import tpu as pltpu

_LANE = 128
_SUBLANE = 8
_TILE_BYTES = 2 * 1024 * 1024  # per-tile budget; x4 live (in+out, double-buffered)


def _identity_kernel(x_ref, o_ref):
    # Pure pass-through of the current VMEM tile.
    o_ref[...] = x_ref[...]


def _choose_2d_shape(total):
    """Pick a lane-dense (rows, cols) factorization of `total`, or None."""
    candidates = (2048, 1024, 512, 256, 128)
    # Prefer full sublane utilization (rows % 8 == 0), widest lanes first.
    for c in candidates:
        if total % c == 0:
            r = total // c
            if r >= _SUBLANE and r % _SUBLANE == 0:
                return r, c
    # Any 128-multiple column width (full-array block stays legal).
    for c in candidates:
        if total % c == 0:
            return total // c, c
    return None


def _choose_row_tile(rows, cols, itemsize):
    """Largest sublane-aligned row block dividing `rows` that fits the budget."""
    if rows % _SUBLANE != 0:
        return rows  # single full-array block (legal: equals the array dims)
    max_rows_by_budget = max(_SUBLANE, _TILE_BYTES // max(1, cols * itemsize))
    for cand in (1024, 512, 256, 128, 64, 32, 16, 8):
        if cand <= max_rows_by_budget and rows % cand == 0:
            return cand
    return rows


def identity(x):
    """Identity forward pass: returns x unchanged (same shape, same dtype)."""
    orig_shape = x.shape
    orig_dtype = x.dtype
    total = x.size

    if total == 0:
        return x  # nothing to move

    shape2d = _choose_2d_shape(total)
    if shape2d is None:
        # Remainder / tiny case: fall back to a single full-array block.
        if x.ndim >= 2:
            shape2d = (total // x.shape[-1], x.shape[-1])
        else:
            shape2d = (1, total)

    rows, cols = shape2d
    x2d = x.reshape(rows, cols)
    tm = _choose_row_tile(rows, cols, jnp.dtype(orig_dtype).itemsize)

    # Alias input->output so no extra HBM buffer is allocated.  Skip aliasing
    # only in the rare case the reshape was a no-op (x2d is x), where eager
    # donation would invalidate the caller's array.
    aliases = {} if x2d is x else {0: 0}

    out2d = pl.pallas_call(
        _identity_kernel,
        out_shape=jax.ShapeDtypeStruct((rows, cols), orig_dtype),
        grid=(rows // tm,),
        in_specs=[pl.BlockSpec((tm, cols), lambda i: (i, 0))],
        out_specs=pl.BlockSpec((tm, cols), lambda i: (i, 0)),
        input_output_aliases=aliases,
        compiler_params=pltpu.CompilerParams(
            dimension_semantics=("parallel",),   # shards across v7x's 2 TCs
            vmem_limit_bytes=32 * 1024 * 1024,   # explicit, generation-safe budget
        ),
    )(x2d)

    return out2d.reshape(orig_shape)


if __name__ == "__main__":
    key = jax.random.PRNGKey(0)

    # NCHW input matching the PyTorch module's typical use.
    x = jax.random.normal(key, (2, 4, 16, 16), dtype=jnp.float32)
    y = jax.block_until_ready(identity(x))
    assert y.shape == x.shape
    assert y.dtype == x.dtype
    assert bool(jnp.all(y == x))

    # Odd-sized input exercises the non-128-multiple fallback path.
    x_odd = jax.random.normal(jax.random.PRNGKey(0), (3, 5, 7), dtype=jnp.float32)
    y_odd = jax.block_until_ready(identity(x_odd))
    assert y_odd.shape == x_odd.shape
    assert y_odd.dtype == x_odd.dtype
    assert bool(jnp.all(y_odd == x_odd))

    print("KERNEL_OK")
</pallas_src>

<mosaic_0001>
module attributes {stable_mosaic.version = 11 : i64} {
  func.func @_identity_kernel(%arg0: i32, %arg1: memref<8x256xf32, #tpu.memory_space<vmem>>, %arg2: memref<8x256xf32, #tpu.memory_space<vmem>>) attributes {dimension_semantics = [#tpu.dimension_semantics<parallel>], iteration_bounds = array<i64: 1>, scalar_prefetch = 0 : i64, scratch_operands = 0 : i64, tpu.core_type = #tpu.core_type<tc>, window_params = [{transform_indices = @transform_0, window_bounds = array<i64: 8, 256>}, {transform_indices = @transform_1, window_bounds = array<i64: 8, 256>}]} {
    %c0 = arith.constant 0 : index
    %c0_0 = arith.constant 0 : index
    %0 = vector.load %arg1[%c0, %c0_0] : memref<8x256xf32, #tpu.memory_space<vmem>>, vector<8x256xf32>
    %c0_1 = arith.constant 0 : index
    %c0_2 = arith.constant 0 : index
    %1 = vector.load %arg2[%c0_1, %c0_2] : memref<8x256xf32, #tpu.memory_space<vmem>>, vector<8x256xf32>
    tpu.vector_store %arg2[%c0_1, %c0_2], %0 {strides = array<i32>} : memref<8x256xf32, #tpu.memory_space<vmem>>, vector<8x256xf32>,
    return
  }
  func.func @transform_0(%arg0: i32) -> (i32, i32) {
    %c0_i32 = arith.constant 0 : i32
    %c0_i32_0 = arith.constant 0 : i32
    return %arg0, %c0_i32 : i32, i32
  }
  func.func @transform_1(%arg0: i32) -> (i32, i32) {
    %c0_i32 = arith.constant 0 : i32
    %c0_i32_0 = arith.constant 0 : i32
    return %arg0, %c0_i32 : i32, i32
  }
}

</mosaic_0001>

<bundles_post_ra>
// kernel: tpu_custom_call.1
= control target key start
LH: loop header
LB: loop body
LE: loop exit
PB: predicated region body
PF: predicated region fallthrough
CT: control target
= control target key end

     0   :  { %6 = vsyncpa [#allocation3], 0  ;;  %s116_s0 = inlined_call_operand.hbm [shape: f32[8,256], index: 0, kind: input, shape index: {}, may-alias: {0,1}]   ;;  %s117_s1 = inlined_call_operand.hbm [shape: f32[8,256], index: 1, kind: output, shape index: {}, may-alias: {0,1}]  }
   0x1   :  { %7 = vsyncpa [#allocation4], 0  ;;  %s13_s8 = sshll.u32 %s116_s0, 4  ;;  %s98_s9 = smov [#allocation2]   ;;  %s14_s8 = int_to_ptr.hbm [resolvable:$true] %s13_s8 }
   0x2   :  { %s15_s10 = sshll.u32 %s98_s9, 4  ;;  %s16_s10 = int_to_ptr.vmem [resolvable:$true] %s15_s10 }
   0x3   :  { %18 = dma.hbm_to_vmem [thread:$0]  %s14_s8, 256, %s16_s10, [#allocation3]  }
   0x4   :  { %94 = dma.done.wait [#allocation3], 256  }
   0x5   :  { %95 = vsyncadd [#allocation3], 4294967040  ;;  %s99_s11 = smov [#allocation5]   ;;  %s34_s15 = sshll.u32 %s117_s1, 4  ;;  %v23_v0 = vld [vmem:[#allocation2] sm:$0xff]  ;;  %v24_v1 = vld [vmem:[#allocation2 + $0x8] sm:$0xff]  ;;  %s35_s15 = int_to_ptr.hbm [resolvable:$true] %s34_s15 }
   0x6   :  { %s32_s12 = sshll.u32 %s99_s11, 4  ;;  %25 = vst [vmem:[#allocation5] sm:$0xff] %v23_v0  ;;  %s33_s12 = int_to_ptr.vmem [resolvable:$true] %s32_s12 }
   0x7   :  { %26 = vst [vmem:[#allocation5 + $0x8] sm:$0xff] %v24_v1 }
   0x8   :  { %37 = dma.vmem_to_hbm [thread:$0]  %s33_s12, 256, %s35_s15, [#allocation4]  }
   0x9   :  { %96 = dma.done.wait [#allocation4], 256  }
   0xa   :  { %97 = vsyncadd [#allocation4], 4294967040 }
   0xb   :  { %42 = vsyncpa [#allocation3], 1 }
   0xc   :  { %43 = vsyncpa [#allocation4], 1 }

</bundles_post_ra>
